<compile_context>
chip_gen: v7x
topology: tpu7x:2x2x1
jax: 0.10.0
libtpu: 0.0.40
codegen_flags: <defaults>
</compile_context>

<pallas_src>
import math
import functools

import jax
import jax.numpy as jnp
from jax.experimental import pallas as pl
from jax.experimental.pallas import tpu as pltpu

# Problem sizes consistent with Encoder(embedding_dim_size=32), 4 heads.
E = 32          # embedding dim
H = 4           # num heads
D = E // H      # head dim = 8
L = 8           # sequence length
N = 2           # batch size
FF = 4 * E      # feed-forward hidden dim
EPS = 1e-5      # LayerNorm eps (PyTorch default)


def _layer_norm(x, gamma, beta):
    mu = jnp.mean(x, axis=-1, keepdims=True)
    var = jnp.mean((x - mu) ** 2, axis=-1, keepdims=True)
    return (x - mu) * jax.lax.rsqrt(var + EPS) * gamma + beta


def encoder_kernel(x_ref,
                   wqkv_ref, bqkv_ref,      # (E, 3E), (1, 3E)  packed [Q|K|V], scale folded into Q cols
                   wo_ref, bo_ref,          # (E, E), (1, E)    out_proj, pre-transposed
                   ln1_g_ref, ln1_b_ref,    # (1, E), (1, E)
                   w1_ref, b1_ref,          # (E, FF), (1, FF)  pre-transposed
                   w2_ref, b2_ref,          # (FF, E), (1, E)   pre-transposed
                   ln2_g_ref, ln2_b_ref,    # (1, E), (1, E)
                   o_ref,                   # (R, E)
                   *, n_heads, head_dim, n_batch):
    x = x_ref[...]                                    # (R, E), rows ordered (seq, batch)
    rows, emb = x.shape

    # --- ONE fused Q/K/V projection: (R,E)@(E,3E); attention scale pre-folded -
    qkv = jnp.dot(x, wqkv_ref[...], preferred_element_type=jnp.float32) + bqkv_ref[...]  # (R, 3E)

    def head_major(base):
        # lane-slice head h's columns and stack -> (H, R, D); small XLU relayout
        return jnp.stack(
            [qkv[:, base + h * head_dim: base + (h + 1) * head_dim] for h in range(n_heads)],
            axis=0)

    q = head_major(0)          # (H, R, D), already scaled by 1/sqrt(D)
    k = head_major(emb)        # (H, R, D)
    v = head_major(2 * emb)    # (H, R, D)

    # --- attention scores for all heads at once; mask cross-batch pairs ------
    s = jnp.einsum('hqd,hkd->hqk', q, k, preferred_element_type=jnp.float32)  # (H, R, R)
    rid = jax.lax.broadcasted_iota(jnp.int32, s.shape, 1) % n_batch
    cid = jax.lax.broadcasted_iota(jnp.int32, s.shape, 2) % n_batch
    s = jnp.where(rid == cid, s, jnp.float32(-1e30))   # finite mask: robust vs. -inf NaNs

    # --- single batched softmax (exact divide; EUP not on the critical path) -
    s = s - jnp.max(s, axis=-1, keepdims=True)
    p = jnp.exp(s)
    p = p / jnp.sum(p, axis=-1, keepdims=True)

    # --- P@V per head, then concat heads along lanes (PyTorch concat order) --
    o = jnp.einsum('hqk,hkd->hqd', p, v, preferred_element_type=jnp.float32)  # (H, R, D)
    o2d = jnp.concatenate([o[h] for h in range(n_heads)], axis=-1)            # (R, E)

    # --- output projection: ONE matmul, head reduction inside MXU accumulator
    attn = jnp.dot(o2d, wo_ref[...], preferred_element_type=jnp.float32) + bo_ref[...]   # (R, E)

    # --- residual + LayerNorm 1 ----------------------------------------------
    y = _layer_norm(x + attn, ln1_g_ref[...], ln1_b_ref[...])

    # --- feed forward (hidden width 128 -> lane-dense intermediate) ----------
    hid = jnp.dot(y, w1_ref[...], preferred_element_type=jnp.float32) + b1_ref[...]
    hid = jnp.maximum(hid, 0.0)                                                # ReLU
    ff = jnp.dot(hid, w2_ref[...], preferred_element_type=jnp.float32) + b2_ref[...]

    # --- residual + LayerNorm 2 ----------------------------------------------
    z = _layer_norm(y + ff, ln2_g_ref[...], ln2_b_ref[...])
    o_ref[...] = z.astype(o_ref.dtype)


def prepare_params(params, n_heads=H):
    """One-time repack of PyTorch-convention weights for the kernel:
    transposed for `x @ W`, Q/K/V packed into one (E, 3E) matrix, and the
    1/sqrt(head_dim) attention scale folded into the Q columns."""
    (in_w, in_b, out_w, out_b,
     ln1_g, ln1_b, w1, b1, w2, b2, ln2_g, ln2_b) = params
    e = in_w.shape[1]
    d = e // n_heads
    scale = 1.0 / math.sqrt(d)

    # in_w is (3E, E) with rows [Q | K | V]; columns of in_w.T are [Q | K | V],
    # each head's d columns contiguous inside its block (matches PyTorch).
    col_scale = jnp.concatenate([jnp.full((e,), scale, jnp.float32),
                                 jnp.ones((2 * e,), jnp.float32)])
    wqkv = in_w.T * col_scale[None, :]            # (E, 3E)
    bqkv = in_b * col_scale[None, :]              # (1, 3E)
    wo = out_w.T                                  # (E, E), rows in head-concat order
    return (wqkv, bqkv, wo, out_b,
            ln1_g, ln1_b, w1.T, b1, w2.T, b2, ln2_g, ln2_b)


@jax.jit
def encoder_forward(embedding, prepared):
    """embedding: (L, N, E) float32 (PyTorch nn.MultiheadAttention layout). Returns (L, N, E)."""
    Ls, Ns, Es = embedding.shape
    x2d = embedding.reshape(Ls * Ns, Es)          # free row-major view, no transpose
    n_heads = H
    head_dim = Es // n_heads

    kernel = functools.partial(encoder_kernel,
                               n_heads=n_heads, head_dim=head_dim, n_batch=Ns)
    n_inputs = 1 + len(prepared)
    out = pl.pallas_call(
        kernel,
        out_shape=jax.ShapeDtypeStruct((Ls * Ns, Es), jnp.float32),
        # no grid: single invocation; every operand whole-array resident in VMEM
        in_specs=[pl.BlockSpec(memory_space=pltpu.MemorySpace.VMEM)] * n_inputs,
        out_specs=pl.BlockSpec(memory_space=pltpu.MemorySpace.VMEM),
    )(x2d, *prepared)
    return out.reshape(Ls, Ns, Es)                # free view back to (L, N, E)


def encoder_reference(embedding, params):
    """Pure-JAX reference reproducing the PyTorch forward pass."""
    (in_w, in_b, out_w, out_b,
     ln1_g, ln1_b, w1, b1, w2, b2, ln2_g, ln2_b) = params
    x = jnp.transpose(embedding, (1, 0, 2))       # (N, L, E)
    qkv = x @ in_w.T + in_b[0]
    q, k, v = jnp.split(qkv, 3, axis=-1)

    def split_heads(t):
        return t.reshape(N, L, H, D).transpose(0, 2, 1, 3)   # (N, H, L, D)

    qh, kh, vh = map(split_heads, (q, k, v))
    s = jnp.einsum('nhqd,nhkd->nhqk', qh, kh) / math.sqrt(D)
    p = jax.nn.softmax(s, axis=-1)
    o = jnp.einsum('nhqk,nhkd->nhqd', p, vh).transpose(0, 2, 1, 3).reshape(N, L, E)
    attn = o @ out_w.T + out_b[0]

    def ln(t, g, b):
        mu = t.mean(-1, keepdims=True)
        var = ((t - mu) ** 2).mean(-1, keepdims=True)
        return (t - mu) / jnp.sqrt(var + EPS) * g[0] + b[0]

    y = ln(x + attn, ln1_g, ln1_b)
    ff = jnp.maximum(y @ w1.T + b1[0], 0.0) @ w2.T + b2[0]
    z = ln(y + ff, ln2_g, ln2_b)
    return jnp.transpose(z, (1, 0, 2))


def make_params(key):
    ks = jax.random.split(key, 8)
    scale = 0.1
    in_w = scale * jax.random.normal(ks[0], (3 * E, E), jnp.float32)
    in_b = scale * jax.random.normal(ks[1], (1, 3 * E), jnp.float32)
    out_w = scale * jax.random.normal(ks[2], (E, E), jnp.float32)
    out_b = scale * jax.random.normal(ks[3], (1, E), jnp.float32)
    ln1_g = jnp.ones((1, E), jnp.float32)
    ln1_b = jnp.zeros((1, E), jnp.float32)
    w1 = scale * jax.random.normal(ks[4], (FF, E), jnp.float32)
    b1 = scale * jax.random.normal(ks[5], (1, FF), jnp.float32)
    w2 = scale * jax.random.normal(ks[6], (E, FF), jnp.float32)
    b2 = scale * jax.random.normal(ks[7], (1, E), jnp.float32)
    ln2_g = jnp.ones((1, E), jnp.float32)
    ln2_b = jnp.zeros((1, E), jnp.float32)
    return (in_w, in_b, out_w, out_b,
            ln1_g, ln1_b, w1, b1, w2, b2, ln2_g, ln2_b)


if __name__ == "__main__":
    key = jax.random.PRNGKey(0)
    k_emb, k_par = jax.random.split(key)
    embedding = jax.random.normal(k_emb, (L, N, E), jnp.float32)   # (seq, batch, embed)
    params = make_params(k_par)
    prepared = prepare_params(params)                              # one-time weight repack

    out = encoder_forward(embedding, prepared)
    out = jax.block_until_ready(out)

    ref = encoder_reference(embedding, params)
    assert out.shape == (L, N, E)
    # All math is f32 with f32 accumulation and an exact softmax divide, so the
    # tolerance is tightened vs. the previous approx-reciprocal version.
    assert jnp.allclose(out, ref, atol=1e-4, rtol=1e-4), "mismatch vs reference"

    print("KERNEL_OK")
</pallas_src>

<mosaic_0001>
module attributes {stable_mosaic.version = 11 : i64} {
  func.func @encoder_kernel(%arg0: memref<16x32xf32, #tpu.memory_space<vmem>>, %arg1: memref<32x96xf32, #tpu.memory_space<vmem>>, %arg2: memref<1x96xf32, #tpu.memory_space<vmem>>, %arg3: memref<32x32xf32, #tpu.memory_space<vmem>>, %arg4: memref<1x32xf32, #tpu.memory_space<vmem>>, %arg5: memref<1x32xf32, #tpu.memory_space<vmem>>, %arg6: memref<1x32xf32, #tpu.memory_space<vmem>>, %arg7: memref<32x128xf32, #tpu.memory_space<vmem>>, %arg8: memref<1x128xf32, #tpu.memory_space<vmem>>, %arg9: memref<128x32xf32, #tpu.memory_space<vmem>>, %arg10: memref<1x32xf32, #tpu.memory_space<vmem>>, %arg11: memref<1x32xf32, #tpu.memory_space<vmem>>, %arg12: memref<1x32xf32, #tpu.memory_space<vmem>>, %arg13: memref<16x32xf32, #tpu.memory_space<vmem>>) attributes {dimension_semantics = [], scalar_prefetch = 0 : i64, scratch_operands = 0 : i64, tpu.core_type = #tpu.core_type<tc>} {
    %c0 = arith.constant 0 : index
    %c0_0 = arith.constant 0 : index
    %0 = vector.load %arg0[%c0, %c0_0] : memref<16x32xf32, #tpu.memory_space<vmem>>, vector<16x32xf32>
    %c0_1 = arith.constant 0 : index
    %c0_2 = arith.constant 0 : index
    %1 = vector.load %arg1[%c0_1, %c0_2] : memref<32x96xf32, #tpu.memory_space<vmem>>, vector<32x96xf32>
    %cst = arith.constant dense<0.000000e+00> : vector<16x96xf32>
    %2 = tpu.matmul %0, %1, %cst {dimension_numbers = #tpu.dot_dimension_numbers<[1], [0], [0], [1], [0, 0, 1, 1], [], []>} : vector<16x32xf32>, vector<32x96xf32>, vector<16x96xf32> -> vector<16x96xf32>
    %c0_3 = arith.constant 0 : index
    %c0_4 = arith.constant 0 : index
    %3 = vector.load %arg2[%c0_3, %c0_4] : memref<1x96xf32, #tpu.memory_space<vmem>>, vector<1x96xf32>
    %4 = vector.broadcast %3 : vector<1x96xf32> to vector<16x96xf32>
    %5 = arith.addf %2, %4 : vector<16x96xf32>
    %6 = vector.extract_strided_slice %5 {offsets = [0, 0], sizes = [16, 8], strides = [1, 1]} : vector<16x96xf32> to vector<16x8xf32>
    %7 = vector.extract_strided_slice %5 {offsets = [0, 8], sizes = [16, 8], strides = [1, 1]} : vector<16x96xf32> to vector<16x8xf32>
    %8 = vector.extract_strided_slice %5 {offsets = [0, 16], sizes = [16, 8], strides = [1, 1]} : vector<16x96xf32> to vector<16x8xf32>
    %9 = vector.extract_strided_slice %5 {offsets = [0, 24], sizes = [16, 8], strides = [1, 1]} : vector<16x96xf32> to vector<16x8xf32>
    %10 = vector.shape_cast %6 : vector<16x8xf32> to vector<1x16x8xf32>
    %11 = vector.shape_cast %7 : vector<16x8xf32> to vector<1x16x8xf32>
    %12 = vector.shape_cast %8 : vector<16x8xf32> to vector<1x16x8xf32>
    %13 = vector.shape_cast %9 : vector<16x8xf32> to vector<1x16x8xf32>
    %14 = tpu.concatenate %10, %11, %12, %13 in 0 : vector<1x16x8xf32>, vector<1x16x8xf32>, vector<1x16x8xf32>, vector<1x16x8xf32> -> vector<4x16x8xf32>
    %15 = vector.extract_strided_slice %5 {offsets = [0, 32], sizes = [16, 8], strides = [1, 1]} : vector<16x96xf32> to vector<16x8xf32>
    %16 = vector.extract_strided_slice %5 {offsets = [0, 40], sizes = [16, 8], strides = [1, 1]} : vector<16x96xf32> to vector<16x8xf32>
    %17 = vector.extract_strided_slice %5 {offsets = [0, 48], sizes = [16, 8], strides = [1, 1]} : vector<16x96xf32> to vector<16x8xf32>
    %18 = vector.extract_strided_slice %5 {offsets = [0, 56], sizes = [16, 8], strides = [1, 1]} : vector<16x96xf32> to vector<16x8xf32>
    %19 = vector.shape_cast %15 : vector<16x8xf32> to vector<1x16x8xf32>
    %20 = vector.shape_cast %16 : vector<16x8xf32> to vector<1x16x8xf32>
    %21 = vector.shape_cast %17 : vector<16x8xf32> to vector<1x16x8xf32>
    %22 = vector.shape_cast %18 : vector<16x8xf32> to vector<1x16x8xf32>
    %23 = tpu.concatenate %19, %20, %21, %22 in 0 : vector<1x16x8xf32>, vector<1x16x8xf32>, vector<1x16x8xf32>, vector<1x16x8xf32> -> vector<4x16x8xf32>
    %24 = vector.extract_strided_slice %5 {offsets = [0, 64], sizes = [16, 8], strides = [1, 1]} : vector<16x96xf32> to vector<16x8xf32>
    %25 = vector.extract_strided_slice %5 {offsets = [0, 72], sizes = [16, 8], strides = [1, 1]} : vector<16x96xf32> to vector<16x8xf32>
    %26 = vector.extract_strided_slice %5 {offsets = [0, 80], sizes = [16, 8], strides = [1, 1]} : vector<16x96xf32> to vector<16x8xf32>
    %27 = vector.extract_strided_slice %5 {offsets = [0, 88], sizes = [16, 8], strides = [1, 1]} : vector<16x96xf32> to vector<16x8xf32>
    %28 = vector.shape_cast %24 : vector<16x8xf32> to vector<1x16x8xf32>
    %29 = vector.shape_cast %25 : vector<16x8xf32> to vector<1x16x8xf32>
    %30 = vector.shape_cast %26 : vector<16x8xf32> to vector<1x16x8xf32>
    %31 = vector.shape_cast %27 : vector<16x8xf32> to vector<1x16x8xf32>
    %32 = tpu.concatenate %28, %29, %30, %31 in 0 : vector<1x16x8xf32>, vector<1x16x8xf32>, vector<1x16x8xf32>, vector<1x16x8xf32> -> vector<4x16x8xf32>
    "tpu.trace_start"() <{level = 10 : i32, message = "hqd,hkd->hqk"}> : () -> ()
    %cst_5 = arith.constant dense<0.000000e+00> : vector<4x16x16xf32>
    %33 = tpu.matmul %14, %23, %cst_5 {dimension_numbers = #tpu.dot_dimension_numbers<[2], [2], [1], [1], [0, 0, 0, 1, 1, 1], [0], [0]>} : vector<4x16x8xf32>, vector<4x16x8xf32>, vector<4x16x16xf32> -> vector<4x16x16xf32>
    "tpu.trace_stop"() : () -> ()
    %34 = tpu.iota {dimensions = array<i32: 1>} : vector<4x16x16xi32>
    %c2_i32 = arith.constant 2 : i32
    %c0_i32 = arith.constant 0 : i32
    %35 = arith.cmpi eq, %c2_i32, %c0_i32 : i32
    %c1_i32 = arith.constant 1 : i32
    %36 = arith.select %35, %c1_i32, %c2_i32 : i32
    %37 = vector.broadcast %36 : i32 to vector<4x16x16xi32>
    %38 = arith.remsi %34, %37 : vector<4x16x16xi32>
    %c0_i32_6 = arith.constant 0 : i32
    %39 = vector.broadcast %c0_i32_6 : i32 to vector<4x16x16xi32>
    %40 = arith.cmpi ne, %38, %39 : vector<4x16x16xi32>
    %c0_i32_7 = arith.constant 0 : i32
    %41 = vector.broadcast %c0_i32_7 : i32 to vector<4x16x16xi32>
    %42 = arith.cmpi slt, %38, %41 : vector<4x16x16xi32>
    %c0_i32_8 = arith.constant 0 : i32
    %43 = arith.cmpi slt, %36, %c0_i32_8 : i32
    %44 = vector.broadcast %43 : i1 to vector<4x16x16xi1>
    %45 = vector.broadcast %44 : vector<4x16x16xi1> to vector<4x16x16xi1>
    %46 = arith.xori %42, %45 : vector<4x16x16xi1>
    %47 = arith.andi %46, %40 : vector<4x16x16xi1>
    %48 = vector.broadcast %36 : i32 to vector<4x16x16xi32>
    %49 = arith.addi %38, %48 : vector<4x16x16xi32>
    %50 = arith.select %47, %49, %38 : vector<4x16x16xi1>, vector<4x16x16xi32>
    %51 = tpu.iota {dimensions = array<i32: 2>} : vector<4x16x16xi32>
    %c2_i32_9 = arith.constant 2 : i32
    %c0_i32_10 = arith.constant 0 : i32
    %52 = arith.cmpi eq, %c2_i32_9, %c0_i32_10 : i32
    %c1_i32_11 = arith.constant 1 : i32
    %53 = arith.select %52, %c1_i32_11, %c2_i32_9 : i32
    %54 = vector.broadcast %53 : i32 to vector<4x16x16xi32>
    %55 = arith.remsi %51, %54 : vector<4x16x16xi32>
    %c0_i32_12 = arith.constant 0 : i32
    %56 = vector.broadcast %c0_i32_12 : i32 to vector<4x16x16xi32>
    %57 = arith.cmpi ne, %55, %56 : vector<4x16x16xi32>
    %c0_i32_13 = arith.constant 0 : i32
    %58 = vector.broadcast %c0_i32_13 : i32 to vector<4x16x16xi32>
    %59 = arith.cmpi slt, %55, %58 : vector<4x16x16xi32>
    %c0_i32_14 = arith.constant 0 : i32
    %60 = arith.cmpi slt, %53, %c0_i32_14 : i32
    %61 = vector.broadcast %60 : i1 to vector<4x16x16xi1>
    %62 = vector.broadcast %61 : vector<4x16x16xi1> to vector<4x16x16xi1>
    %63 = arith.xori %59, %62 : vector<4x16x16xi1>
    %64 = arith.andi %63, %57 : vector<4x16x16xi1>
    %65 = vector.broadcast %53 : i32 to vector<4x16x16xi32>
    %66 = arith.addi %55, %65 : vector<4x16x16xi32>
    %67 = arith.select %64, %66, %55 : vector<4x16x16xi1>, vector<4x16x16xi32>
    %68 = arith.cmpi eq, %50, %67 : vector<4x16x16xi32>
    %cst_15 = arith.constant -1.000000e+30 : f32
    %69 = vector.broadcast %cst_15 : f32 to vector<4x16x16xf32>
    %70 = arith.select %68, %33, %69 : vector<4x16x16xi1>, vector<4x16x16xf32>
    %cst_16 = arith.constant dense<0xFF800000> : vector<4x16xf32>
    %71 = vector.multi_reduction <maximumf>, %70, %cst_16 [2] : vector<4x16x16xf32> to vector<4x16xf32>
    %72 = vector.shape_cast %71 : vector<4x16xf32> to vector<4x16x1xf32>
    %73 = vector.broadcast %72 : vector<4x16x1xf32> to vector<4x16x16xf32>
    %74 = arith.subf %70, %73 : vector<4x16x16xf32>
    %75 = math.exp %74 : vector<4x16x16xf32>
    %cst_17 = arith.constant dense<0.000000e+00> : vector<4x16xf32>
    %76 = vector.multi_reduction <add>, %75, %cst_17 [2] : vector<4x16x16xf32> to vector<4x16xf32>
    %77 = vector.shape_cast %76 : vector<4x16xf32> to vector<4x16x1xf32>
    %78 = vector.broadcast %77 : vector<4x16x1xf32> to vector<4x16x16xf32>
    %79 = arith.divf %75, %78 : vector<4x16x16xf32>
    "tpu.trace_start"() <{level = 10 : i32, message = "hqk,hkd->hqd"}> : () -> ()
    %cst_18 = arith.constant dense<0.000000e+00> : vector<4x16x8xf32>
    %80 = tpu.matmul %79, %32, %cst_18 {dimension_numbers = #tpu.dot_dimension_numbers<[2], [1], [1], [2], [0, 0, 0, 1, 1, 2], [0], [0]>} : vector<4x16x16xf32>, vector<4x16x8xf32>, vector<4x16x8xf32> -> vector<4x16x8xf32>
    "tpu.trace_stop"() : () -> ()
    %81 = vector.extract_strided_slice %80 {offsets = [0, 0, 0], sizes = [1, 16, 8], strides = [1, 1, 1]} : vector<4x16x8xf32> to vector<1x16x8xf32>
    %82 = vector.shape_cast %81 : vector<1x16x8xf32> to vector<16x8xf32>
    %83 = vector.extract_strided_slice %80 {offsets = [1, 0, 0], sizes = [1, 16, 8], strides = [1, 1, 1]} : vector<4x16x8xf32> to vector<1x16x8xf32>
    %84 = vector.shape_cast %83 : vector<1x16x8xf32> to vector<16x8xf32>
    %85 = vector.extract_strided_slice %80 {offsets = [2, 0, 0], sizes = [1, 16, 8], strides = [1, 1, 1]} : vector<4x16x8xf32> to vector<1x16x8xf32>
    %86 = vector.shape_cast %85 : vector<1x16x8xf32> to vector<16x8xf32>
    %87 = vector.extract_strided_slice %80 {offsets = [3, 0, 0], sizes = [1, 16, 8], strides = [1, 1, 1]} : vector<4x16x8xf32> to vector<1x16x8xf32>
    %88 = vector.shape_cast %87 : vector<1x16x8xf32> to vector<16x8xf32>
    %89 = tpu.concatenate %82, %84, %86, %88 in 1 : vector<16x8xf32>, vector<16x8xf32>, vector<16x8xf32>, vector<16x8xf32> -> vector<16x32xf32>
    %c0_19 = arith.constant 0 : index
    %c0_20 = arith.constant 0 : index
    %90 = vector.load %arg3[%c0_19, %c0_20] : memref<32x32xf32, #tpu.memory_space<vmem>>, vector<32x32xf32>
    %cst_21 = arith.constant dense<0.000000e+00> : vector<16x32xf32>
    %91 = tpu.matmul %89, %90, %cst_21 {dimension_numbers = #tpu.dot_dimension_numbers<[1], [0], [0], [1], [0, 0, 1, 1], [], []>} : vector<16x32xf32>, vector<32x32xf32>, vector<16x32xf32> -> vector<16x32xf32>
    %c0_22 = arith.constant 0 : index
    %c0_23 = arith.constant 0 : index
    %92 = vector.load %arg4[%c0_22, %c0_23] : memref<1x32xf32, #tpu.memory_space<vmem>>, vector<1x32xf32>
    %93 = vector.broadcast %92 : vector<1x32xf32> to vector<16x32xf32>
    %94 = arith.addf %91, %93 : vector<16x32xf32>
    %95 = arith.addf %0, %94 : vector<16x32xf32>
    %c0_24 = arith.constant 0 : index
    %c0_25 = arith.constant 0 : index
    %96 = vector.load %arg5[%c0_24, %c0_25] : memref<1x32xf32, #tpu.memory_space<vmem>>, vector<1x32xf32>
    %c0_26 = arith.constant 0 : index
    %c0_27 = arith.constant 0 : index
    %97 = vector.load %arg6[%c0_26, %c0_27] : memref<1x32xf32, #tpu.memory_space<vmem>>, vector<1x32xf32>
    %cst_28 = arith.constant dense<0.000000e+00> : vector<16xf32>
    %98 = vector.multi_reduction <add>, %95, %cst_28 [1] : vector<16x32xf32> to vector<16xf32>
    %99 = vector.shape_cast %98 : vector<16xf32> to vector<16x1xf32>
    %cst_29 = arith.constant 3.200000e+01 : f32
    %100 = vector.broadcast %cst_29 : f32 to vector<16x1xf32>
    %101 = arith.divf %99, %100 : vector<16x1xf32>
    %102 = vector.broadcast %101 : vector<16x1xf32> to vector<16x32xf32>
    %103 = arith.subf %95, %102 : vector<16x32xf32>
    %104 = arith.mulf %103, %103 : vector<16x32xf32>
    %cst_30 = arith.constant dense<0.000000e+00> : vector<16xf32>
    %105 = vector.multi_reduction <add>, %104, %cst_30 [1] : vector<16x32xf32> to vector<16xf32>
    %106 = vector.shape_cast %105 : vector<16xf32> to vector<16x1xf32>
    %cst_31 = arith.constant 3.200000e+01 : f32
    %107 = vector.broadcast %cst_31 : f32 to vector<16x1xf32>
    %108 = arith.divf %106, %107 : vector<16x1xf32>
    %109 = vector.broadcast %101 : vector<16x1xf32> to vector<16x32xf32>
    %110 = arith.subf %95, %109 : vector<16x32xf32>
    %cst_32 = arith.constant 9.99999974E-6 : f32
    %111 = vector.broadcast %cst_32 : f32 to vector<16x1xf32>
    %112 = arith.addf %108, %111 : vector<16x1xf32>
    %113 = math.rsqrt %112 : vector<16x1xf32>
    %114 = vector.broadcast %113 : vector<16x1xf32> to vector<16x32xf32>
    %115 = arith.mulf %110, %114 : vector<16x32xf32>
    %116 = vector.broadcast %96 : vector<1x32xf32> to vector<16x32xf32>
    %117 = arith.mulf %115, %116 : vector<16x32xf32>
    %118 = vector.broadcast %97 : vector<1x32xf32> to vector<16x32xf32>
    %119 = arith.addf %117, %118 : vector<16x32xf32>
    %c0_33 = arith.constant 0 : index
    %c0_34 = arith.constant 0 : index
    %120 = vector.load %arg7[%c0_33, %c0_34] : memref<32x128xf32, #tpu.memory_space<vmem>>, vector<32x128xf32>
    %cst_35 = arith.constant dense<0.000000e+00> : vector<16x128xf32>
    %121 = tpu.matmul %119, %120, %cst_35 {dimension_numbers = #tpu.dot_dimension_numbers<[1], [0], [0], [1], [0, 0, 1, 1], [], []>} : vector<16x32xf32>, vector<32x128xf32>, vector<16x128xf32> -> vector<16x128xf32>
    %c0_36 = arith.constant 0 : index
    %c0_37 = arith.constant 0 : index
    %122 = vector.load %arg8[%c0_36, %c0_37] : memref<1x128xf32, #tpu.memory_space<vmem>>, vector<1x128xf32>
    %123 = vector.broadcast %122 : vector<1x128xf32> to vector<16x128xf32>
    %124 = arith.addf %121, %123 : vector<16x128xf32>
    %cst_38 = arith.constant 0.000000e+00 : f32
    %125 = vector.broadcast %cst_38 : f32 to vector<16x128xf32>
    %126 = arith.maximumf %124, %125 : vector<16x128xf32>
    %c0_39 = arith.constant 0 : index
    %c0_40 = arith.constant 0 : index
    %127 = vector.load %arg9[%c0_39, %c0_40] : memref<128x32xf32, #tpu.memory_space<vmem>>, vector<128x32xf32>
    %cst_41 = arith.constant dense<0.000000e+00> : vector<16x32xf32>
    %128 = tpu.matmul %126, %127, %cst_41 {dimension_numbers = #tpu.dot_dimension_numbers<[1], [0], [0], [1], [0, 0, 1, 1], [], []>} : vector<16x128xf32>, vector<128x32xf32>, vector<16x32xf32> -> vector<16x32xf32>
    %c0_42 = arith.constant 0 : index
    %c0_43 = arith.constant 0 : index
    %129 = vector.load %arg10[%c0_42, %c0_43] : memref<1x32xf32, #tpu.memory_space<vmem>>, vector<1x32xf32>
    %130 = vector.broadcast %129 : vector<1x32xf32> to vector<16x32xf32>
    %131 = arith.addf %128, %130 : vector<16x32xf32>
    %132 = arith.addf %119, %131 : vector<16x32xf32>
    %c0_44 = arith.constant 0 : index
    %c0_45 = arith.constant 0 : index
    %133 = vector.load %arg11[%c0_44, %c0_45] : memref<1x32xf32, #tpu.memory_space<vmem>>, vector<1x32xf32>
    %c0_46 = arith.constant 0 : index
    %c0_47 = arith.constant 0 : index
    %134 = vector.load %arg12[%c0_46, %c0_47] : memref<1x32xf32, #tpu.memory_space<vmem>>, vector<1x32xf32>
    %cst_48 = arith.constant dense<0.000000e+00> : vector<16xf32>
    %135 = vector.multi_reduction <add>, %132, %cst_48 [1] : vector<16x32xf32> to vector<16xf32>
    %136 = vector.shape_cast %135 : vector<16xf32> to vector<16x1xf32>
    %cst_49 = arith.constant 3.200000e+01 : f32
    %137 = vector.broadcast %cst_49 : f32 to vector<16x1xf32>
    %138 = arith.divf %136, %137 : vector<16x1xf32>
    %139 = vector.broadcast %138 : vector<16x1xf32> to vector<16x32xf32>
    %140 = arith.subf %132, %139 : vector<16x32xf32>
    %141 = arith.mulf %140, %140 : vector<16x32xf32>
    %cst_50 = arith.constant dense<0.000000e+00> : vector<16xf32>
    %142 = vector.multi_reduction <add>, %141, %cst_50 [1] : vector<16x32xf32> to vector<16xf32>
    %143 = vector.shape_cast %142 : vector<16xf32> to vector<16x1xf32>
    %cst_51 = arith.constant 3.200000e+01 : f32
    %144 = vector.broadcast %cst_51 : f32 to vector<16x1xf32>
    %145 = arith.divf %143, %144 : vector<16x1xf32>
    %146 = vector.broadcast %138 : vector<16x1xf32> to vector<16x32xf32>
    %147 = arith.subf %132, %146 : vector<16x32xf32>
    %cst_52 = arith.constant 9.99999974E-6 : f32
    %148 = vector.broadcast %cst_52 : f32 to vector<16x1xf32>
    %149 = arith.addf %145, %148 : vector<16x1xf32>
    %150 = math.rsqrt %149 : vector<16x1xf32>
    %151 = vector.broadcast %150 : vector<16x1xf32> to vector<16x32xf32>
    %152 = arith.mulf %147, %151 : vector<16x32xf32>
    %153 = vector.broadcast %133 : vector<1x32xf32> to vector<16x32xf32>
    %154 = arith.mulf %152, %153 : vector<16x32xf32>
    %155 = vector.broadcast %134 : vector<1x32xf32> to vector<16x32xf32>
    %156 = arith.addf %154, %155 : vector<16x32xf32>
    %c0_53 = arith.constant 0 : index
    %c0_54 = arith.constant 0 : index
    %157 = vector.load %arg13[%c0_53, %c0_54] : memref<16x32xf32, #tpu.memory_space<vmem>>, vector<16x32xf32>
    tpu.vector_store %arg13[%c0_53, %c0_54], %156 {strides = array<i32>} : memref<16x32xf32, #tpu.memory_space<vmem>>, vector<16x32xf32>,
    return
  }
}

</mosaic_0001>

<bundles_post_ra>
// kernel: encoder_forward.1
= control target key start
LH: loop header
LB: loop body
LE: loop exit
PB: predicated region body
PF: predicated region fallthrough
CT: control target
= control target key end

     0   :  { %vm58_vm0 = vcmask 261120   ;;  %s2213_s0 = inlined_call_operand.vmem [shape: f32[16,32], index: 0, kind: input, shape index: {}]   ;;  %s2214_s1 = inlined_call_operand.vmem [shape: f32[32,96], index: 1, kind: input, shape index: {}]   ;;  %s2215_s2 = inlined_call_operand.vmem [shape: f32[1,96], index: 2, kind: input, shape index: {}]   ;;  %s2216_s3 = inlined_call_operand.vmem [shape: f32[32,32], index: 3, kind: input, shape index: {}]   ;;  %s2217_s4 = inlined_call_operand.vmem [shape: f32[1,32], index: 4, kind: input, shape index: {}]   ;;  %s2218_s5 = inlined_call_operand.vmem [shape: f32[1,32], index: 5, kind: input, shape index: {}]   ;;  %s2219_s6 = inlined_call_operand.vmem [shape: f32[1,32], index: 6, kind: input, shape index: {}]   ;;  %s2220_s7 = inlined_call_operand.vmem [shape: f32[32,128], index: 7, kind: input, shape index: {}]   ;;  %s2221_s8 = inlined_call_operand.vmem [shape: f32[1,128], index: 8, kind: input, shape index: {}]   ;;  %s2222_s9 = inlined_call_operand.vmem [shape: f32[128,32], index: 9, kind: input, shape index: {}]   ;;  %s2223_s10 = inlined_call_operand.vmem [shape: f32[1,32], index: 10, kind: input, shape index: {}]   ;;  %s2224_s11 = inlined_call_operand.vmem [shape: f32[1,32], index: 11, kind: input, shape index: {}]   ;;  %s2225_s12 = inlined_call_operand.vmem [shape: f32[1,32], index: 12, kind: input, shape index: {}]   ;;  %s2226_s13 = inlined_call_operand.hbm [shape: f32[16,32], index: 13, kind: output, shape index: {}]  }
   0x1   :  { %v47_v0 = vld [vmem:[%s2214_s1] sm:$0xff]  ;;  %v48_v1 = vld [vmem:[%s2214_s1 + $0x8] sm:$0xff]  ;;  %v49_v2 = vld [vmem:[%s2214_s1 + $0x10] sm:$0xff] }
   0x2   :  { %v1647_v3 = vpack.c.bf16 %v48_v1, %v47_v0  ;;  %v50_v4 = vld [vmem:[%s2214_s1 + $0x18] sm:$0xff]  ;;  %v1952_v5 = vld [vmem:[%s2213_s0] sm:$0xff] }
   0x3   :  { %v1651_v6 = vpack.c.bf16 %v50_v4, %v49_v2  ;;  %1531 = vmatprep.mubr.msk.f32.mxu1 %vm58_vm0, %v1952_v5 }
   0x4   :  { %18 = vsyncpa [#allocation3], 0  ;;  %1648 = vmatprep.subr.bf16.mxu1 %v1647_v3  ;;  %v1959_v7 = vld [vmem:[%s2213_s0 + $0x8] sm:$0xff]  ;;  %v1417_v8 = vld [vmem:[%s2215_s2] ss:$0 sm:$0xff]  ;;  %vm158_vm1 = vcmask 64512   ;;  %v503_v40 = vlaneseq }
   0x5   :  { %1650 = vmatpush3.bf16.msra.mxu1 %v1647_v3  ;;  %s1857_s21 = smov 112   ;;  %s1858_s22 = smov 120   ;;  %vm1982_vm2 = vmpackc.low %vm158_vm1, %vm158_vm1  ;;  %vm554_vm5 = vcmask 130048   ;;  %vm1019_vm6 = vcmask 195584  }
   0x6   :  { %1652 = vmatprep.subr.bf16.mxu1 %v1651_v6  ;;  %s1859_s0 = smov 104   ;;  %s1860_s23 = smov 96   ;;  %v504_v41 = vshrl.u32 %v503_v40, 7  ;;  %v531_v43 = vand.u32 127, %v503_v40 }
   0x7   :  { %s1861_s2 = smov 64   ;;  %s1862_s28 = smov 8  }
   0x8   :  { %v505_v42 = vadd.s32 8, %v504_v41  ;;  %v536_v45 = vand.u32 1, %v531_v43  ;;  %v510_v46 = vand.u32 1, %v504_v41  ;;  %s1863_s16 = smov 16   ;;  %s1864_s17 = smov 24  }
   0x9   :  { %1654 = vmatpush3.bf16.msra.mxu1 %v1651_v6  ;;  %s1865_s20 = smov [#allocation2]  }
   0xa   :  { %v517_v44 = vand.u32 1, %v505_v42  ;;  %vm2012_vm4 = vcmp.eq.s32.totalorder %v510_v46, %v536_v45 }
   0xc   :  { %1532 = vmatmul.mubr.msk.f32.vlgmr.msra.gmra.mrb[0].mxu1 %vm58_vm0, %v1959_v7  ;;  %vm2008_vm3 = vcmp.eq.s32.totalorder %v517_v44, %v536_v45 }
  0xdf   :  { %v1533_v9 = vpop.f32.mrb[0].mxu1 }
  0xe0   :  { %v137_v10 = vadd.f32 %v1533_v9, %v1417_v8  ;;  %v131_v11 = vpop.f32.mrb[1].mxu1 }
  0xe1   :  { %v132_v12 = vadd.f32 %v1417_v8, %v131_v11 }
  0xe2   :  { %148 = vrot.lane.b32.xlu1 %v137_v10, %s1857_s21 }
  0xe3   :  { %142 = vrot.lane.b32.xlu0 %v132_v12, %s1858_s22  ;;  %1538 = vmatprep.mubr.msk.f32.mxu1 %vm158_vm1, %v132_v12  ;;  %v1967_v13 = vpack.i.bf16 %v137_v10, %v132_v12 }
  0xe6   :  { %146 = vrot.lane.b32.xlu1 %v132_v12, %s1857_s21  ;;  %s1406_s21 = sshll.u32 %s1865_s20, 4  ;;  %s1407_s21 = int_to_ptr.vmem [resolvable:$true] %s1406_s21 }
  0xe7   :  { %144 = vrot.lane.b32.xlu0 %v137_v10, %s1858_s22  ;;  %s1833_s22 = scalar_lea.vmem %s1407_s21, 256  ;;  %p1838_p1 = scmp.lt.s32.totalorder %s1407_s21, %s1407_s21 }
  0xe8   :  { %p1834_p0 = scmp.ne.s32.totalorder %s1407_s21, %s1833_s22  ;;  %p1839_p2 = scmp.lt.s32.totalorder %s1833_s22, %s1833_s22 }
  0xea   :  { %152 = vrot.lane.b32.xlu1 %v137_v10, %s1859_s0  ;;  %p1840_p3 = por %p1839_p2, %p1838_p1 }
  0xeb   :  { %150 = vrot.lane.b32.xlu0 %v132_v12, %s1859_s0 }
  0xec   :  { %p1841_p4 = pnand %p1840_p3, %p1834_p0 }
  0xef   :  { %1754 = vrot.lane.b32.xlu0 %v1967_v13, %s1860_s23 }
 0x154   :  { %v149_v14 = vpop.permute.xlu1 %148 }
 0x155   :  { %v143_v15 = vpop.permute.xlu0 %142 }
 0x158   :  { %v147_v16 = vpop.permute.xlu1 %146 }
 0x159   :  { %v1970_v17 = vpack.i.bf16 %v149_v14, %v147_v16  ;;  %v145_v18 = vpop.permute.xlu0 %144 }
 0x15a   :  { %v1972_v19 = vpack.i.bf16 %v145_v18, %v143_v15 }
 0x15b   :  { %1764 = vrot.lane.b32.xlu0 %v1970_v17, %s1860_s23 }
 0x15c   :  { %v153_v20 = vpop.permute.xlu1 %152  ;;  %1759 = vrot.lane.b32.xlu1 %v1972_v19, %s1860_s23 }
 0x15d   :  { %v151_v21 = vpop.permute.xlu0 %150 }
 0x15e   :  { %v1976_v22 = vpack.i.bf16 %v153_v20, %v151_v21  ;;  %1559 = vmatprep.mubr.msk.f32.mxu0 %vm158_vm1, %v151_v21 }
 0x160   :  { %1769 = vrot.lane.b32.xlu1 %v1976_v22, %s1860_s23 }
 0x161   :  { %v1755_v23 = vpop.permute.xlu0 %1754 }
 0x162   :  { %v1757_v24 = vunpack.i.h.bf16 %v1755_v23  ;;  %v1756_v25 = vunpack.i.l.bf16 %v1755_v23 }
 0x164   :  { %v1655_v27 = vpack.c.bf16 %v1757_v24, %v1756_v25 }
 0x166   :  { %1657 = vmatprep.subr.msk.bf16.mxu1 %vm1982_vm2, %v1655_v27 }
 0x167   :  { %1660 = vmatpush3.bf16.xpose.msk.msra.mxu1 %vm1982_vm2, %v1655_v27 }
 0x16e   :  { %1539 = vmatmul.mubr.msk.f32.vlgmr.msra.gmra.mrb[2].mxu1 %vm158_vm1, %v137_v10 }
 0x16f   :  { %1545 = vmatprep.mubr.msk.f32.mxu1 %vm158_vm1, %v143_v15 }
 0x1cd   :  { %v1765_v28 = vpop.permute.xlu0 %1764 }
 0x1ce   :  { %v1760_v29 = vpop.permute.xlu1 %1759  ;;  %v1767_v30 = vunpack.i.h.bf16 %v1765_v28  ;;  %v1766_v31 = vunpack.i.l.bf16 %v1765_v28 }
 0x1cf   :  { %v1762_v32 = vunpack.i.h.bf16 %v1760_v29  ;;  %v1761_v33 = vunpack.i.l.bf16 %v1760_v29 }
 0x1d0   :  { %v1667_v36 = vpack.c.bf16 %v1767_v30, %v1766_v31 }
 0x1d1   :  { %v1661_v34 = vpack.c.bf16 %v1762_v32, %v1761_v33 }
 0x1d2   :  { %v1770_v35 = vpop.permute.xlu1 %1769 }
 0x1d3   :  { %v1772_v37 = vunpack.i.h.bf16 %v1770_v35  ;;  %v1771_v38 = vunpack.i.l.bf16 %v1770_v35  ;;  %1663 = vmatprep.subr.msk.bf16.mxu1 %vm1982_vm2, %v1661_v34 }
 0x1d4   :  { %1666 = vmatpush3.bf16.xpose.msk.msra.mxu1 %vm1982_vm2, %v1661_v34 }
 0x1d5   :  { %1669 = vmatprep.subr.msk.bf16.mxu1 %vm1982_vm2, %v1667_v36  ;;  %v1673_v39 = vpack.c.bf16 %v1772_v37, %v1771_v38 }
 0x1d7   :  { %1675 = vmatprep.subr.msk.bf16.mxu0 %vm1982_vm2, %v1673_v39 }
 0x1d8   :  { %1678 = vmatpush3.bf16.xpose.msk.msra.mxu0 %vm1982_vm2, %v1673_v39 }
 0x1db   :  { %1546 = vmatmul.mubr.msk.f32.vlgmr.msra.gmra.mrb[4].mxu1 %vm158_vm1, %v145_v18 }
 0x1dc   :  { %1672 = vmatpush3.bf16.xpose.msk.msra.mxu1 %vm1982_vm2, %v1667_v36  ;;  %1552 = vmatprep.mubr.msk.f32.mxu1 %vm158_vm1, %v147_v16 }
 0x1df   :  { %1560 = vmatmul.mubr.msk.f32.vlgmr.msra.gmra.mrb[0].mxu0 %vm158_vm1, %v153_v20 }
 0x1e3   :  { %1553 = vmatmul.mubr.msk.f32.vlgmr.msra.gmra.mrb[6].mxu1 %vm158_vm1, %v149_v14 }
 0x241   :  { %v1540_v49 = vpop.f32.mrb[2].mxu1 }
 0x242   :  { %v547_v50 = vsel %vm2008_vm3, %v1540_v49, -1e+30  ;;  %v233_v51 = vpop.f32.mrb[3].mxu1 }
 0x243   :  { %v546_v52 = vsel %vm2012_vm4, %v233_v51, -1e+30  ;;  %v558_v53 = vsel %vm554_vm5, %v547_v50, -inf }
 0x244   :  { %559 = vmax.xlane.f32.xlu1 %v558_v53  ;;  %v555_v54 = vsel %vm554_vm5, %v546_v52, -inf }
 0x245   :  { %556 = vmax.xlane.f32.xlu0 %v555_v54 }
 0x2ae   :  { %v1547_v55 = vpop.f32.mrb[4].mxu1 }
 0x2af   :  { %v549_v56 = vsel %vm2008_vm3, %v1547_v55, -1e+30  ;;  %v320_v57 = vpop.f32.mrb[5].mxu1 }
 0x2b0   :  { %v564_v58 = vsel %vm554_vm5, %v549_v56, -inf  ;;  %v548_v59 = vsel %vm2012_vm4, %v320_v57, -1e+30 }
 0x2b1   :  { %565 = vmax.xlane.f32.xlu0 %v564_v58  ;;  %v561_v63 = vsel %vm554_vm5, %v548_v59, -inf }
 0x2b2   :  { %v1561_v60 = vpop.f32.mrb[0].mxu0 }
 0x2b3   :  { %v494_v61 = vpop.f32.mrb[1].mxu0  ;;  %v553_v8 = vsel %vm2008_vm3, %v1561_v60, -1e+30 }
 0x2b4   :  { %v552_v62 = vsel %vm2012_vm4, %v494_v61, -1e+30  ;;  %v576_v10 = vsel %vm554_vm5, %v553_v8, -inf }
 0x2b5   :  { %562 = vmax.xlane.f32.xlu0 %v561_v63  ;;  %v573_v0 = vsel %vm554_vm5, %v552_v62, -inf }
 0x2b6   :  { %574 = vmax.xlane.f32.xlu1 %v573_v0  ;;  %v1554_v1 = vpop.f32.mrb[6].mxu1 }
 0x2b7   :  { %v551_v2 = vsel %vm2008_vm3, %v1554_v1, -1e+30  ;;  %v407_v3 = vpop.f32.mrb[7].mxu1 }
 0x2b8   :  { %v2035_v4 = vsel %vm2012_vm4, %v407_v3, -1e+30  ;;  %v570_v6 = vsel %vm554_vm5, %v551_v2, -inf }
 0x2b9   :  { %571 = vmax.xlane.f32.xlu0 %v570_v6  ;;  %v567_v9 = vsel %vm554_vm5, %v2035_v4, -inf }
 0x2ba   :  { %568 = vmax.xlane.f32.xlu1 %v567_v9 }
 0x2bd   :  { %577 = vmax.xlane.f32.xlu0 %v576_v10 }
 0x2cb   :  { %1774 = vrot.lane.b32.xlu1 %v1967_v13, %s1861_s2 }
 0x2d1   :  { %v560_v11 = vpop.xlane.xlu1 %559 }
 0x2d2   :  { %v580_v12 = vsub.f32 %v547_v50, %v560_v11  ;;  %v557_v15 = vpop.xlane.xlu0 %556 }
 0x2d3   :  { %v579_v16 = vsub.f32 %v546_v52, %v557_v15 }
 0x2d4   :  { %v589_v14 = vmul.f32 1.442695, %v580_v12 }
 0x2d5   :  { %v587_v18 = vmul.f32 1.442695, %v579_v16 }
 0x2d6   :  { %1793 = vpow2.f32 %v589_v14 }
 0x2d7   :  { %1795 = vpow2.f32 %v587_v18 }
 0x2e0   :  { %v1794_v20 = vpop.eup %1793 }
 0x2e1   :  { %v606_v21 = vsel %vm554_vm5, %v1794_v20, 0.0  ;;  %v1796_v23 = vpop.eup %1795 }
 0x2e2   :  { %607 = vadd.xlane.f32.xlu0 %v606_v21  ;;  %v603_v24 = vsel %vm554_vm5, %v1796_v23, 0.0 }
 0x2ef   :  { %604 = vadd.xlane.f32.xlu1 %v603_v24 }
 0x33e   :  { %v566_v25 = vpop.xlane.xlu0 %565 }
 0x33f   :  { %v582_v26 = vsub.f32 %v549_v56, %v566_v25 }
 0x341   :  { %v593_v27 = vmul.f32 1.442695, %v582_v26 }
 0x342   :  { %v563_v13 = vpop.xlane.xlu0 %562 }
 0x343   :  { %1797 = vpow2.f32 %v593_v27  ;;  %v581_v28 = vsub.f32 %v548_v59, %v563_v13  ;;  %v575_v29 = vpop.xlane.xlu1 %574 }
 0x344   :  { %v585_v30 = vsub.f32 %v552_v62, %v575_v29 }
 0x345   :  { %v591_v31 = vmul.f32 1.442695, %v581_v28 }
 0x346   :  { %v599_v32 = vmul.f32 1.442695, %v585_v30  ;;  %v572_v33 = vpop.xlane.xlu0 %571 }
 0x347   :  { %1799 = vpow2.f32 %v591_v31  ;;  %v569_v34 = vpop.xlane.xlu1 %568  ;;  %v584_v35 = vsub.f32 %v551_v2, %v572_v33 }
 0x348   :  { %1801 = vpow2.f32 %v599_v32  ;;  %v583_v54 = vsub.f32 %v2035_v4, %v569_v34  ;;  %v1022_v34 = vld [vmem:[%s2216_s3] sm:$0xff] }
 0x349   :  { %v597_v42 = vmul.f32 1.442695, %v584_v35  ;;  %v1023_v35 = vld [vmem:[%s2216_s3 + $0x8] sm:$0xff] }
 0x34a   :  { %v578_v36 = vpop.xlane.xlu0 %577  ;;  %v595_v56 = vmul.f32 1.442695, %v583_v54 }
 0x34b   :  { %v586_v37 = vsub.f32 %v553_v8, %v578_v36  ;;  %v1775_v38 = vpop.permute.xlu1 %1774  ;;  %v1695_v36 = vpack.c.bf16 %v1023_v35, %v1022_v34  ;;  %v1265_v34 = vld [vmem:[%s2222_s9 + $0x50] sm:$0xff]  ;;  %v1266_v35 = vld [vmem:[%s2222_s9 + $0x58] sm:$0xff] }
 0x34c   :  { %v1777_v39 = vunpack.i.h.bf16 %v1775_v38  ;;  %v1776_v40 = vunpack.i.l.bf16 %v1775_v38 }
 0x34d   :  { %v2047_v41 = vpop.eup %1797  ;;  %v601_v43 = vmul.f32 1.442695, %v586_v37 }
 0x34e   :  { %v1679_v44 = vpack.c.bf16 %v1777_v39, %v1776_v40  ;;  %v612_v45 = vsel %vm554_vm5, %v2047_v41, 0.0  ;;  %v1024_v39 = vld [vmem:[%s2216_s3 + $0x10] sm:$0xff]  ;;  %v1025_v40 = vld [vmem:[%s2216_s3 + $0x18] sm:$0xff] }
 0x34f   :  { %1803 = vpow2.f32 %v601_v43  ;;  %613 = vadd.xlane.f32.xlu0 %v612_v45 }
 0x350   :  { %1680 = vmatprep.subr.bf16.mxu1 %v1679_v44  ;;  %1805 = vpow2.f32 %v597_v42 }
 0x351   :  { %v1800_v46 = vpop.eup %1799  ;;  %1682 = vmatpush3.bf16.msra.mxu1 %v1679_v44 }
 0x352   :  { %v609_v47 = vsel %vm554_vm5, %v1800_v46, 0.0  ;;  %v1802_v48 = vpop.eup %1801 }
 0x353   :  { %610 = vadd.xlane.f32.xlu1 %v609_v47  ;;  %v621_v49 = vsel %vm554_vm5, %v1802_v48, 0.0 }
 0x357   :  { %622 = vadd.xlane.f32.xlu1 %v621_v49 }
 0x359   :  { %v2053_v50 = vpop.eup %1803 }
 0x35a   :  { %v624_v51 = vsel %vm554_vm5, %v2053_v50, 0.0  ;;  %v2057_v52 = vpop.eup %1805 }
 0x35b   :  { %625 = vadd.xlane.f32.xlu0 %v624_v51  ;;  %v618_v53 = vsel %vm554_vm5, %v2057_v52, 0.0 }
 0x35f   :  { %619 = vadd.xlane.f32.xlu0 %v618_v53 }
 0x368   :  { %1784 = vrot.lane.b32.xlu1 %v1970_v17, %s1861_s2 }
 0x36f   :  { %v608_v55 = vpop.xlane.xlu0 %607 }
 0x370   :  { %1807 = vrcp.f32 %v608_v55 }
 0x375   :  { %1779 = vrot.lane.b32.xlu0 %v1972_v19, %s1861_s2 }
 0x37a   :  { %v1808_v58 = vpop.eup %1807 }
 0x37b   :  { %v630_v62 = vmul.f32 %v1808_v58, %v1794_v20  ;;  %v1444_v58 = vld [vmem:[%s2217_s4] ss:$0 sm:$0xff] }
 0x37c   :  { %v605_v57 = vpop.xlane.xlu1 %604 }
 0x37d   :  { %1809 = vrcp.f32 %v605_v57 }
 0x37e   :  { %1811 = vpow2.f32 %v595_v56 }
 0x387   :  { %v1810_v59 = vpop.eup %1809 }
 0x388   :  { %v1812_v60 = vpop.eup %1811  ;;  %v628_v61 = vmul.f32 %v1810_v59, %v1796_v23 }
 0x389   :  { %v615_v17 = vsel %vm554_vm5, %v1812_v60, 0.0 }
 0x38a   :  { %1566 = vmatprep.mubr.msk.f32.mxu1 %vm554_vm5, %v628_v61 }
 0x38b   :  { %1567 = vmatmul.mubr.msk.f32.vlgmr.msra.gmra.mrb[8].mxu1 %vm554_vm5, %v630_v62 }
 0x38c   :  { %616 = vadd.xlane.f32.xlu1 %v615_v17 }
 0x39d   :  { %1789 = vrot.lane.b32.xlu1 %v1976_v22, %s1861_s2 }
 0x3dc   :  { %v614_v63 = vpop.xlane.xlu0 %613 }
 0x3e0   :  { %v611_v19 = vpop.xlane.xlu1 %610 }
 0x3e1   :  { %1813 = vrcp.f32 %v611_v19 }
 0x3e2   :  { %1815 = vrcp.f32 %v614_v63 }
 0x3e4   :  { %v623_v0 = vpop.xlane.xlu1 %622 }
 0x3e5   :  { %1817 = vrcp.f32 %v623_v0 }
 0x3e8   :  { %v626_v1 = vpop.xlane.xlu0 %625  ;;  %v1785_v2 = vpop.permute.xlu1 %1784 }
 0x3e9   :  { %v1787_v3 = vunpack.i.h.bf16 %v1785_v2  ;;  %v1786_v4 = vunpack.i.l.bf16 %v1785_v2  ;;  %1819 = vrcp.f32 %v626_v1 }
 0x3eb   :  { %v1814_v6 = vpop.eup %1813  ;;  %v1687_v8 = vpack.c.bf16 %v1787_v3, %v1786_v4 }
 0x3ec   :  { %v620_v9 = vpop.xlane.xlu0 %619  ;;  %v632_v10 = vmul.f32 %v1814_v6, %v1800_v46  ;;  %v1816_v15 = vpop.eup %1815 }
 0x3ed   :  { %1688 = vmatprep.subr.bf16.mxu0 %v1687_v8  ;;  %v634_v18 = vmul.f32 %v1816_v15, %v2047_v41  ;;  %1821 = vrcp.f32 %v620_v9  ;;  %v1699_v41 = vpack.c.bf16 %v1025_v40, %v1024_v39  ;;  %v1164_v15 = vld [vmem:[%s2220_s7 + $0x18] sm:$0xff] }
 0x3ee   :  { %1573 = vmatprep.mubr.msk.f32.mxu1 %vm554_vm5, %v632_v10  ;;  %1690 = vmatpush3.bf16.msra.mxu0 %v1687_v8 }
 0x3ef   :  { %v1818_v16 = vpop.eup %1817  ;;  %1696 = vmatprep.subr.bf16.mxu0 %v1695_v36 }
 0x3f0   :  { %v1780_v11 = vpop.permute.xlu0 %1779  ;;  %v640_v20 = vmul.f32 %v1818_v16, %v1802_v48 }
 0x3f1   :  { %v1782_v22 = vunpack.i.h.bf16 %v1780_v11  ;;  %v1781_v12 = vunpack.i.l.bf16 %v1780_v11  ;;  %v1161_v11 = vld [vmem:[%s2220_s7] sm:$0xff] }
 0x3f3   :  { %v1683_v14 = vpack.c.bf16 %v1782_v22, %v1781_v12  ;;  %v1820_v27 = vpop.eup %1819  ;;  %v1162_v22 = vld [vmem:[%s2220_s7 + $0x8] sm:$0xff] }
 0x3f4   :  { %v642_v29 = vmul.f32 %v1820_v27, %v2053_v50  ;;  %v1703_v12 = vpack.c.bf16 %v1162_v22, %v1161_v11  ;;  %v1260_v27 = vld [vmem:[%s2222_s9 + $0x28] sm:$0xff] }
 0x3f5   :  { %1684 = vmatprep.subr.bf16.mxu1 %v1683_v14 }
 0x3f6   :  { %1686 = vmatpush3.bf16.msra.mxu1 %v1683_v14  ;;  %v1163_v14 = vld [vmem:[%s2220_s7 + $0x10] sm:$0xff] }
 0x3f7   :  { %v1822_v13 = vpop.eup %1821  ;;  %v1707_v16 = vpack.c.bf16 %v1164_v15, %v1163_v14 }
 0x3f8   :  { %v638_v31 = vmul.f32 %v1822_v13, %v2057_v52 }
 0x3f9   :  { %1574 = vmatmul.mubr.msk.f32.vlgmr.msra.gmra.mrb[10].mxu1 %vm554_vm5, %v634_v18  ;;  %v1255_v18 = vld [vmem:[%s2222_s9] sm:$0xff] }
 0x3fa   :  { %1587 = vmatprep.mubr.msk.f32.mxu1 %vm554_vm5, %v640_v20  ;;  %v1256_v20 = vld [vmem:[%s2222_s9 + $0x8] sm:$0xff] }
 0x419   :  { %v617_v21 = vpop.xlane.xlu1 %616 }
 0x41a   :  { %1823 = vrcp.f32 %v617_v21  ;;  %v1257_v21 = vld [vmem:[%s2222_s9 + $0x10] sm:$0xff] }
 0x41d   :  { %v1790_v23 = vpop.permute.xlu1 %1789 }
 0x41e   :  { %v1792_v24 = vunpack.i.h.bf16 %v1790_v23  ;;  %v1791_v25 = vunpack.i.l.bf16 %v1790_v23  ;;  %v1711_v23 = vpack.c.bf16 %v1256_v20, %v1255_v18 }
 0x420   :  { %v1691_v26 = vpack.c.bf16 %v1792_v24, %v1791_v25  ;;  %v1258_v24 = vld [vmem:[%s2222_s9 + $0x18] sm:$0xff] }
 0x421   :  { %v1715_v25 = vpack.c.bf16 %v1258_v24, %v1257_v21 }
 0x422   :  { %1692 = vmatprep.subr.bf16.mxu1 %v1691_v26 }
 0x423   :  { %1694 = vmatpush3.bf16.msra.mxu1 %v1691_v26  ;;  %v1259_v26 = vld [vmem:[%s2222_s9 + $0x20] sm:$0xff] }
 0x424   :  { %v1824_v28 = vpop.eup %1823  ;;  %1704 = vmatprep.subr.bf16.mxu1 %v1703_v12  ;;  %v1719_v13 = vpack.c.bf16 %v1260_v27, %v1259_v26 }
 0x425   :  { %v636_v30 = vmul.f32 %v1824_v28, %v1812_v60  ;;  %v1261_v28 = vld [vmem:[%s2222_s9 + $0x30] sm:$0xff] }
 0x426   :  { %1588 = vmatmul.mubr.msk.f32.vlgmr.msra.gmra.mrb[12].mxu1 %vm554_vm5, %v642_v29  ;;  %v1262_v29 = vld [vmem:[%s2222_s9 + $0x38] sm:$0xff] }
 0x427   :  { %1580 = vmatprep.mubr.msk.f32.mxu0 %vm554_vm5, %v636_v30  ;;  %1706 = vmatpush3.bf16.msra.mxu1 %v1703_v12  ;;  %v1723_v30 = vpack.c.bf16 %v1262_v29, %v1261_v28  ;;  %v1453_v28 = vld [vmem:[%s2224_s11] ss:$0 sm:$0xff] }
 0x428   :  { %1581 = vmatmul.mubr.msk.f32.vlgmr.msra.gmra.mrb[2].mxu0 %vm554_vm5, %v638_v31  ;;  %1708 = vmatprep.subr.bf16.mxu1 %v1707_v16  ;;  %v1263_v31 = vld [vmem:[%s2222_s9 + $0x40] sm:$0xff] }
 0x429   :  { %1698 = vmatpush3.bf16.msra.mxu0 %v1695_v36  ;;  %v1731_v36 = vpack.c.bf16 %v1266_v35, %v1265_v34 }
 0x42a   :  { %1700 = vmatprep.subr.bf16.mxu0 %v1699_v41 }
 0x42b   :  { %1710 = vmatpush3.bf16.msra.mxu1 %v1707_v16 }
 0x42d   :  { %1702 = vmatpush3.bf16.msra.mxu0 %v1699_v41 }
 0x42e   :  { %1712 = vmatprep.subr.bf16.mxu0 %v1711_v23 }
 0x45e   :  { %v1568_v32 = vpop.f32.mrb[8].mxu1 }
 0x45f   :  { %v721_v33 = vpop.f32.mrb[9].mxu1 }
 0x4cc   :  { %v1575_v37 = vpop.f32.mrb[10].mxu1 }
 0x4cd   :  { %995 = vrot.lane.b32.xlu1 %v1575_v37, %s1862_s28  ;;  %v808_v38 = vpop.f32.mrb[11].mxu1  ;;  %v1267_v37 = vld [vmem:[%s2222_s9 + $0x60] sm:$0xff] }
 0x4ce   :  { %993 = vrot.lane.b32.xlu0 %v808_v38, %s1862_s28  ;;  %v1268_v38 = vld [vmem:[%s2222_s9 + $0x68] sm:$0xff] }
 0x4cf   :  { %v1735_v39 = vpack.c.bf16 %v1268_v38, %v1267_v37 }
 0x4f9   :  { %v1589_v42 = vpop.f32.mrb[12].mxu1 }
 0x4fa   :  { %v982_v43 = vpop.f32.mrb[13].mxu1 }
 0x4fb   :  { %v1582_v44 = vpop.f32.mrb[2].mxu0 }
 0x4fc   :  { %v895_v45 = vpop.f32.mrb[3].mxu0  ;;  %1003 = vrot.lane.b32.xlu1 %v1582_v44, %s1863_s16 }
 0x4fd   :  { %1001 = vrot.lane.b32.xlu0 %v895_v45, %s1863_s16 }
 0x500   :  { %1011 = vrot.lane.b32.xlu1 %v1589_v42, %s1864_s17 }
 0x501   :  { %1009 = vrot.lane.b32.xlu0 %v982_v43, %s1864_s17 }
 0x53f   :  { %v996_v46 = vpop.permute.xlu1 %995 }
 0x540   :  { %v994_v47 = vpop.permute.xlu0 %993  ;;  %v1016_v52 = vsel %vm158_vm1, %v1568_v32, %v996_v46  ;;  %v1264_v32 = vld [vmem:[%s2222_s9 + $0x48] sm:$0xff] }
 0x541   :  { %v1015_v50 = vsel %vm158_vm1, %v721_v33, %v994_v47  ;;  %v1727_v33 = vpack.c.bf16 %v1264_v32, %v1263_v31  ;;  %v1447_v47 = vld [vmem:[%s2218_s5] ss:$0 sm:$0xff] }
 0x542   :  { %v1454_v32 = vld [vmem:[%s2225_s12] ss:$0 sm:$0xff] }
 0x56e   :  { %v1004_v48 = vpop.permute.xlu1 %1003 }
 0x56f   :  { %v1002_v49 = vpop.permute.xlu0 %1001  ;;  %v1018_v55 = vsel %vm554_vm5, %v1016_v52, %v1004_v48 }
 0x570   :  { %v1017_v53 = vsel %vm554_vm5, %v1015_v50, %v1002_v49  ;;  %v1448_v49 = vld [vmem:[%s2219_s6] ss:$0 sm:$0xff] }
 0x572   :  { %v1012_v51 = vpop.permute.xlu1 %1011 }
 0x573   :  { %v1010_v54 = vpop.permute.xlu0 %1009  ;;  %v1021_v57 = vsel %vm1019_vm6, %v1018_v55, %v1012_v51 }
 0x574   :  { %v1020_v56 = vsel %vm1019_vm6, %v1017_v53, %v1010_v54 }
 0x575   :  { %1598 = vmatprep.mubr.msk.f32.mxu0 %vm58_vm0, %v1020_v56  ;;  %v1269_v56 = vld [vmem:[%s2222_s9 + $0x70] sm:$0xff] }
 0x576   :  { %1599 = vmatmul.mubr.msk.f32.vlgmr.msra.gmra.mrb[4].mxu0 %vm58_vm0, %v1021_v57  ;;  %v1270_v57 = vld [vmem:[%s2222_s9 + $0x78] sm:$0xff] }
 0x577   :  { %1714 = vmatpush3.bf16.msra.mxu0 %v1711_v23 }
 0x578   :  { %1716 = vmatprep.subr.bf16.mxu0 %v1715_v25 }
 0x57b   :  { %1718 = vmatpush3.bf16.msra.mxu0 %v1715_v25 }
 0x57c   :  { %1720 = vmatprep.subr.bf16.mxu0 %v1719_v13 }
 0x57f   :  { %1722 = vmatpush3.bf16.msra.mxu0 %v1719_v13 }
 0x580   :  { %1724 = vmatprep.subr.bf16.mxu0 %v1723_v30 }
 0x583   :  { %1726 = vmatpush3.bf16.msra.mxu0 %v1723_v30 }
 0x584   :  { %1728 = vmatprep.subr.bf16.mxu0 %v1727_v33 }
 0x587   :  { %1730 = vmatpush3.bf16.msra.mxu0 %v1727_v33 }
 0x588   :  { %1732 = vmatprep.subr.bf16.mxu0 %v1731_v36 }
 0x58b   :  { %1734 = vmatpush3.bf16.msra.mxu0 %v1731_v36 }
 0x58c   :  { %1736 = vmatprep.subr.bf16.mxu0 %v1735_v39 }
 0x58f   :  { %1738 = vmatpush3.bf16.msra.mxu0 %v1735_v39 }
 0x649   :  { %v1600_v59 = vpop.f32.mrb[4].mxu0 }
 0x64a   :  { %v1111_v60 = vadd.f32 %v1600_v59, %v1444_v58  ;;  %v1105_v61 = vpop.f32.mrb[5].mxu0  ;;  %v1449_v59 = vld [vmem:[%s2221_s8] ss:$0 sm:$0xff] }
 0x64b   :  { %v1106_v62 = vadd.f32 %v1444_v58, %v1105_v61  ;;  %v1739_v58 = vpack.c.bf16 %v1270_v57, %v1269_v56 }
 0x64c   :  { %v1115_v17 = vadd.f32 %v1111_v60, %v1959_v7 }
 0x64d   :  { %v1114_v19 = vadd.f32 %v1106_v62, %v1952_v5  ;;  %1740 = vmatprep.subr.bf16.mxu0 %v1739_v58 }
 0x64e   :  { %v1121_v63 = vsel %vm58_vm0, %v1115_v17, 0.0  ;;  %1742 = vmatpush3.bf16.msra.mxu0 %v1739_v58 }
 0x64f   :  { %1122 = vadd.xlane.f32.xlu1 %v1121_v63  ;;  %v1118_v0 = vsel %vm58_vm0, %v1114_v19, 0.0 }
 0x650   :  { %1119 = vadd.xlane.f32.xlu0 %v1118_v0  ;;  %v1452_v0 = vld [vmem:[%s2223_s10] ss:$0 sm:$0xff] }
 0x6dc   :  { %v1123_v1 = vpop.xlane.xlu1 %1122 }
 0x6dd   :  { %v1126_v2 = vmul.f32 0.03125, %v1123_v1  ;;  %v1120_v3 = vpop.xlane.xlu0 %1119 }
 0x6de   :  { %v1125_v4 = vmul.f32 0.03125, %v1120_v3 }
 0x6df   :  { %v2107_v6 = vsub.f32 %v1115_v17, %v1126_v2 }
 0x6e0   :  { %v1127_v8 = vsub.f32 %v1114_v19, %v1125_v4 }
 0x6e1   :  { %v1130_v7 = vmul.f32 %v2107_v6, %v2107_v6 }
 0x6e2   :  { %v1129_v9 = vmul.f32 %v1127_v8, %v1127_v8 }
 0x6e3   :  { %v1134_v5 = vsel %vm58_vm0, %v1130_v7, 0.0 }
 0x6e4   :  { %v1131_v10 = vsel %vm58_vm0, %v1129_v9, 0.0 }
 0x6e5   :  { %1132 = vadd.xlane.f32.xlu0 %v1131_v10 }
 0x6e9   :  { %1135 = vadd.xlane.f32.xlu0 %v1134_v5 }
 0x772   :  { %v1133_v40 = vpop.xlane.xlu0 %1132 }
 0x773   :  { %v1137_v41 = vmul.f32 0.03125, %v1133_v40 }
 0x775   :  { %v1139_v42 = vadd.f32 1e-05, %v1137_v41 }
 0x776   :  { %v1136_v43 = vpop.xlane.xlu0 %1135 }
 0x777   :  { %1825 = vrsqrt.f32 %v1139_v42  ;;  %v1138_v44 = vmul.f32 0.03125, %v1136_v43 }
 0x779   :  { %v1140_v45 = vadd.f32 1e-05, %v1138_v44 }
 0x77b   :  { %1827 = vrsqrt.f32 %v1140_v45 }
 0x781   :  { %v1826_v46 = vpop.eup %1825 }
 0x782   :  { %v1143_v48 = vmul.f32 %v1826_v46, %v1127_v8 }
 0x784   :  { %v1151_v50 = vmul.f32 %v1447_v47, %v1143_v48 }
 0x785   :  { %v1828_v51 = vpop.eup %1827 }
 0x786   :  { %v1144_v52 = vmul.f32 %v1828_v51, %v2107_v6  ;;  %v1159_v53 = vadd.f32 %v1448_v49, %v1151_v50 }
 0x788   :  { %v1152_v54 = vmul.f32 %v1447_v47, %v1144_v52  ;;  %1609 = vmatprep.mubr.msk.f32.mxu1 %vm58_vm0, %v1159_v53 }
 0x78a   :  { %v1160_v55 = vadd.f32 %v1448_v49, %v1152_v54 }
 0x78c   :  { %1610 = vmatmul.mubr.msk.f32.vlgmr.msra.gmra.mrb[14].mxu1 %vm58_vm0, %v1160_v55 }
 0x85f   :  { %v1611_v60 = vpop.f32.mrb[14].mxu1 }
 0x860   :  { %v1250_v61 = vadd.f32 %v1611_v60, %v1449_v59  ;;  %v1244_v62 = vpop.f32.mrb[15].mxu1 }
 0x861   :  { %v1245_v17 = vadd.f32 %v1449_v59, %v1244_v62 }
 0x862   :  { %v1254_v63 = vmax.f32 %v1250_v61, 0.0 }
 0x863   :  { %v1253_v19 = vmax.f32 %v1245_v17, 0.0 }
 0x865   :  { %1644 = vmatprep.mubr.f32.mxu0 %v1253_v19 }
 0x866   :  { %1645 = vmatmul.mubr.f32.vlgmr.msra.gmra.mrb[6].mxu0 %v1254_v63 }
 0x939   :  { %v1646_v1 = vpop.f32.mrb[6].mxu0 }
 0x93a   :  { %v1350_v2 = vadd.f32 %v1646_v1, %v1452_v0  ;;  %v1344_v3 = vpop.f32.mrb[7].mxu0 }
 0x93b   :  { %v1345_v4 = vadd.f32 %v1452_v0, %v1344_v3 }
 0x93c   :  { %v1354_v6 = vadd.f32 %v1350_v2, %v1160_v55 }
 0x93d   :  { %v1353_v8 = vadd.f32 %v1345_v4, %v1159_v53 }
 0x93e   :  { %v1360_v9 = vsel %vm58_vm0, %v1354_v6, 0.0 }
 0x93f   :  { %1361 = vadd.xlane.f32.xlu0 %v1360_v9  ;;  %v1357_v10 = vsel %vm58_vm0, %v1353_v8, 0.0 }
 0x940   :  { %1358 = vadd.xlane.f32.xlu1 %v1357_v10 }
 0x9cc   :  { %v1362_v7 = vpop.xlane.xlu0 %1361 }
 0x9cd   :  { %v1364_v5 = vmul.f32 0.03125, %v1362_v7  ;;  %v1359_v11 = vpop.xlane.xlu1 %1358 }
 0x9ce   :  { %v1363_v22 = vmul.f32 0.03125, %v1359_v11 }
 0x9cf   :  { %v1366_v12 = vsub.f32 %v1354_v6, %v1364_v5 }
 0x9d0   :  { %v1365_v14 = vsub.f32 %v1353_v8, %v1363_v22 }
 0x9d1   :  { %v1368_v15 = vmul.f32 %v1366_v12, %v1366_v12 }
 0x9d2   :  { %v1367_v16 = vmul.f32 %v1365_v14, %v1365_v14 }
 0x9d3   :  { %v1372_v18 = vsel %vm58_vm0, %v1368_v15, 0.0 }
 0x9d4   :  { %1373 = vadd.xlane.f32.xlu0 %v1372_v18  ;;  %v1369_v20 = vsel %vm58_vm0, %v1367_v16, 0.0 }
 0x9d5   :  { %1370 = vadd.xlane.f32.xlu1 %v1369_v20 }
 0xa61   :  { %v1374_v21 = vpop.xlane.xlu0 %1373 }
 0xa62   :  { %v1376_v23 = vmul.f32 0.03125, %v1374_v21  ;;  %v1371_v24 = vpop.xlane.xlu1 %1370 }
 0xa63   :  { %v1375_v25 = vmul.f32 0.03125, %v1371_v24 }
 0xa64   :  { %v1378_v26 = vadd.f32 1e-05, %v1376_v23 }
 0xa65   :  { %v1377_v27 = vadd.f32 1e-05, %v1375_v25 }
 0xa66   :  { %1829 = vrsqrt.f32 %v1378_v26 }
 0xa67   :  { %1831 = vrsqrt.f32 %v1377_v27 }
 0xa70   :  { %v1830_v13 = vpop.eup %1829 }
 0xa71   :  { %v1832_v29 = vpop.eup %1831  ;;  %v1382_v30 = vmul.f32 %v1830_v13, %v1366_v12 }
 0xa72   :  { %v1381_v31 = vmul.f32 %v1832_v29, %v1365_v14 }
 0xa73   :  { %v1390_v33 = vmul.f32 %v1453_v28, %v1382_v30 }
 0xa74   :  { %v1389_v34 = vmul.f32 %v1453_v28, %v1381_v31 }
 0xa75   :  { %v1398_v35 = vadd.f32 %v1454_v32, %v1390_v33 }
 0xa76   :  { %v1397_v36 = vadd.f32 %v1454_v32, %v1389_v34 }
 0xa77   :  { %1400 = vst.msk [vmem:[#allocation2 + $0x8] sm:$0xff] %vm58_vm0, %v1398_v35 }
 0xa78   :  { %1399 = vst.msk [vmem:[#allocation2] sm:$0xff] %vm58_vm0, %v1397_v36 }
 0xa79   :  { %1844 = shalt.err (!%p1841_p4)
}
 0xa7a   :  { %s1845_s0 = scalar_lea.hbm %s2226_s13, 256 }
 0xa7b   :  { %p1846_p5 = scmp.ne.s32.totalorder %s2226_s13, %s1845_s0  ;;  %p1849_p6 = scmp.lt.u32.totalorder %s1845_s0, %s2226_s13 }
 0xa7d   :  { %p1851_p7 = pnand %p1849_p6, %p1846_p5 }
 0xa7f   :  { %1854 = shalt.err (!%p1851_p7)
}
 0xa80   :  { %s1866_s26 = smov 128  }
 0xa81   :  { %1412 = dma.vmem_to_hbm [thread:$0]  %s1407_s21, 256, %s2226_s13, [#allocation3], %s1866_s26, %s1866_s26, %s1862_s28  }
 0xa82   :  { %1855 = dma.done.wait [#allocation3], 256  }
 0xa83   :  { %1856 = vsyncadd [#allocation3], 4294967040 }
 0xa84   :  { %1416 = vsyncpa [#allocation3], 1 }

</bundles_post_ra>
